<compile_context>
chip_gen: v6e
topology: v6e:2x2x1
jax: 0.10.0
libtpu: 0.0.40
codegen_flags: <defaults>
</compile_context>

<pallas_src>
import functools

import jax
import jax.numpy as jnp
from jax.experimental import pallas as pl
from jax.experimental.pallas import tpu as pltpu


# ----------------------------------------------------------------------------
# Fused kernel: SumList + Conv1x1(+ReLU) + Conv1x1, NCHW-native.
#
# Per grid step the refs are:
#   x_i  : (1, Cin,   hw_tile)   one tile of each list input
#   w1t  : (Hidden, Cin)         whole array (VMEM resident)
#   b1   : (Hidden, 1)
#   w2t  : (Cout, Hidden)
#   b2   : (Cout, 1)
#   o    : (1, Cout,  hw_tile)
# ----------------------------------------------------------------------------
def _fused_kernel(*refs, num_inputs):
    x_refs = refs[:num_inputs]
    w1t_ref, b1_ref, w2t_ref, b2_ref, o_ref = refs[num_inputs:]

    # SumList: elementwise sum over the list (VPU).
    s = x_refs[0][0]                                   # (Cin, hw_tile)
    for r in x_refs[1:]:
        s = s + r[0]

    # Conv1x1 (Cin -> Hidden) + bias + ReLU.  Left matmul keeps the spatial
    # axis on the lanes -> lane-dense intermediates and output.
    h = jnp.dot(w1t_ref[...], s, preferred_element_type=jnp.float32)
    h = jnp.maximum(h + b1_ref[...], 0.0)              # (Hidden, hw_tile)

    # Conv1x1 (Hidden -> Cout) + bias.
    o = jnp.dot(w2t_ref[...], h, preferred_element_type=jnp.float32)
    o = o + b2_ref[...]                                # (Cout, hw_tile)

    o_ref[0] = o.astype(o_ref.dtype)


# ----------------------------------------------------------------------------
# ListSequential equivalent: apply submodules in order to a list input.
# ----------------------------------------------------------------------------
def list_sequential_forward(inputs_nchw, params, *, max_hw_tile=2048):
    """inputs_nchw: list (arbitrary length >= 1) of NCHW float32 arrays.

    Mirrors ListSequential.forward with modules [SumList, Conv1x1+ReLU, Conv1x1].
    Returns an NCHW float32 array.
    """
    num_inputs = len(inputs_nchw)
    n, c, h, w = inputs_nchw[0].shape
    hw = h * w
    hidden = params["w1"].shape[1]
    cout = params["w2"].shape[1]

    # Flatten spatial dims (no transpose: NCHW -> (N, C, H*W) is a pure reshape)
    # and zero-pad the lane axis up to a multiple of 128.  The 1x1 conv is
    # per-pixel, so padded pixels are independent garbage that we slice off.
    hw_pad = ((hw + 127) // 128) * 128
    xs = []
    for t in inputs_nchw:
        t = t.reshape(n, c, hw)
        if hw_pad != hw:
            t = jnp.pad(t, ((0, 0), (0, 0), (0, hw_pad - hw)))
        xs.append(t)

    # Largest lane tile (multiple of 128) that divides hw_pad, capped.
    hw_tile = min(hw_pad, max_hw_tile)
    while hw_pad % hw_tile != 0:
        hw_tile -= 128

    # Weights in "left-matmul" orientation; biases as columns.
    w1t = jnp.transpose(params["w1"])            # (Hidden, Cin)
    b1c = params["b1"].reshape(hidden, 1)
    w2t = jnp.transpose(params["w2"])            # (Cout, Hidden)
    b2c = params["b2"].reshape(cout, 1)

    grid = (n, hw_pad // hw_tile)

    in_specs = (
        [pl.BlockSpec((1, c, hw_tile), lambda b, j: (b, 0, j))
         for _ in range(num_inputs)]
        + [
            pl.BlockSpec((hidden, c), lambda b, j: (0, 0)),
            pl.BlockSpec((hidden, 1), lambda b, j: (0, 0)),
            pl.BlockSpec((cout, hidden), lambda b, j: (0, 0)),
            pl.BlockSpec((cout, 1), lambda b, j: (0, 0)),
        ]
    )
    out_spec = pl.BlockSpec((1, cout, hw_tile), lambda b, j: (b, 0, j))

    elem = jnp.float32(0).dtype.itemsize
    cost = pl.CostEstimate(
        flops=2 * n * hw_pad * (c * hidden + hidden * cout)
        + n * hw_pad * c * max(num_inputs - 1, 0),
        transcendentals=0,
        bytes_accessed=n * hw_pad * (num_inputs * c + cout) * elem
        + (c * hidden + hidden + hidden * cout + cout) * elem,
    )

    kernel = functools.partial(_fused_kernel, num_inputs=num_inputs)

    out = pl.pallas_call(
        kernel,
        out_shape=jax.ShapeDtypeStruct((n, cout, hw_pad), jnp.float32),
        grid_spec=pl.GridSpec(
            grid=grid,
            in_specs=in_specs,
            out_specs=out_spec,
        ),
        compiler_params=pltpu.CompilerParams(
            dimension_semantics=("parallel", "parallel"),
        ),
        cost_estimate=cost,
    )(*xs, w1t, b1c, w2t, b2c)

    if hw_pad != hw:
        out = out[:, :, :hw]
    return out.reshape(n, cout, h, w)


# ----------------------------------------------------------------------------
# Pure-JAX reference for correctness check
# ----------------------------------------------------------------------------
def reference_forward(inputs_nchw, params):
    x = sum(inputs_nchw)                                                  # SumList
    x = jnp.einsum("nchw,cd->ndhw", x, params["w1"]) + params["b1"][None, :, None, None]
    x = jnp.maximum(x, 0.0)                                               # Conv1x1 + ReLU
    x = jnp.einsum("nchw,cd->ndhw", x, params["w2"]) + params["b2"][None, :, None, None]
    return x


if __name__ == "__main__":
    key = jax.random.PRNGKey(0)
    k_in0, k_in1, k_in2, k_w1, k_b1, k_w2, k_b2 = jax.random.split(key, 7)

    N, C, H, W = 2, 4, 16, 16
    HIDDEN = 32

    inputs = [
        jax.random.normal(k_in0, (N, C, H, W), dtype=jnp.float32),
        jax.random.normal(k_in1, (N, C, H, W), dtype=jnp.float32),
        jax.random.normal(k_in2, (N, C, H, W), dtype=jnp.float32),
    ]

    params = {
        "w1": jax.random.normal(k_w1, (C, HIDDEN), dtype=jnp.float32) * 0.1,
        "b1": jax.random.normal(k_b1, (HIDDEN,), dtype=jnp.float32) * 0.1,
        "w2": jax.random.normal(k_w2, (HIDDEN, C), dtype=jnp.float32) * 0.1,
        "b2": jax.random.normal(k_b2, (C,), dtype=jnp.float32) * 0.1,
    }

    out = list_sequential_forward(inputs, params)
    out = jax.block_until_ready(out)

    ref = reference_forward(inputs, params)
    assert out.shape == (N, C, H, W), out.shape
    assert jnp.allclose(out, ref, atol=1e-4, rtol=1e-4), "mismatch vs reference"

    print("KERNEL_OK")
</pallas_src>

<mosaic_0001>
module attributes {stable_mosaic.version = 11 : i64} {
  func.func @_fused_kernel(%arg0: i32, %arg1: i32, %arg2: memref<1x4x256xf32, #tpu.memory_space<vmem>>, %arg3: memref<1x4x256xf32, #tpu.memory_space<vmem>>, %arg4: memref<1x4x256xf32, #tpu.memory_space<vmem>>, %arg5: memref<32x4xf32, #tpu.memory_space<vmem>>, %arg6: memref<32x1xf32, #tpu.memory_space<vmem>>, %arg7: memref<4x32xf32, #tpu.memory_space<vmem>>, %arg8: memref<4x1xf32, #tpu.memory_space<vmem>>, %arg9: memref<1x4x256xf32, #tpu.memory_space<vmem>>) attributes {dimension_semantics = [#tpu.dimension_semantics<parallel>, #tpu.dimension_semantics<parallel>], iteration_bounds = array<i64: 2, 1>, scalar_prefetch = 0 : i64, scratch_operands = 0 : i64, tpu.core_type = #tpu.core_type<tc>, window_params = [{transform_indices = @transform_0, window_bounds = array<i64: 1, 4, 256>}, {transform_indices = @transform_1, window_bounds = array<i64: 1, 4, 256>}, {transform_indices = @transform_2, window_bounds = array<i64: 1, 4, 256>}, {pipeline_mode = #tpu.pipeline_mode<synchronous>, transform_indices = @transform_3, window_bounds = array<i64: 32, 4>}, {pipeline_mode = #tpu.pipeline_mode<synchronous>, transform_indices = @transform_4, window_bounds = array<i64: 32, 1>}, {pipeline_mode = #tpu.pipeline_mode<synchronous>, transform_indices = @transform_5, window_bounds = array<i64: 4, 32>}, {pipeline_mode = #tpu.pipeline_mode<synchronous>, transform_indices = @transform_6, window_bounds = array<i64: 4, 1>}, {transform_indices = @transform_7, window_bounds = array<i64: 1, 4, 256>}]} {
    %c0 = arith.constant 0 : index
    %c0_0 = arith.constant 0 : index
    %c0_1 = arith.constant 0 : index
    %0 = vector.load %arg2[%c0, %c0_0, %c0_1] : memref<1x4x256xf32, #tpu.memory_space<vmem>>, vector<1x4x256xf32>
    %1 = vector.shape_cast %0 : vector<1x4x256xf32> to vector<4x256xf32>
    %c0_2 = arith.constant 0 : index
    %c0_3 = arith.constant 0 : index
    %c0_4 = arith.constant 0 : index
    %2 = vector.load %arg3[%c0_2, %c0_3, %c0_4] : memref<1x4x256xf32, #tpu.memory_space<vmem>>, vector<1x4x256xf32>
    %3 = vector.shape_cast %2 : vector<1x4x256xf32> to vector<4x256xf32>
    %4 = arith.addf %1, %3 : vector<4x256xf32>
    %c0_5 = arith.constant 0 : index
    %c0_6 = arith.constant 0 : index
    %c0_7 = arith.constant 0 : index
    %5 = vector.load %arg4[%c0_5, %c0_6, %c0_7] : memref<1x4x256xf32, #tpu.memory_space<vmem>>, vector<1x4x256xf32>
    %6 = vector.shape_cast %5 : vector<1x4x256xf32> to vector<4x256xf32>
    %7 = arith.addf %4, %6 : vector<4x256xf32>
    %c0_8 = arith.constant 0 : index
    %c0_9 = arith.constant 0 : index
    %8 = vector.load %arg5[%c0_8, %c0_9] : memref<32x4xf32, #tpu.memory_space<vmem>>, vector<32x4xf32>
    %cst = arith.constant dense<0.000000e+00> : vector<32x256xf32>
    %9 = tpu.matmul %8, %7, %cst {dimension_numbers = #tpu.dot_dimension_numbers<[1], [0], [0], [1], [0, 0, 1, 1], [], []>} : vector<32x4xf32>, vector<4x256xf32>, vector<32x256xf32> -> vector<32x256xf32>
    %c0_10 = arith.constant 0 : index
    %c0_11 = arith.constant 0 : index
    %10 = vector.load %arg6[%c0_10, %c0_11] : memref<32x1xf32, #tpu.memory_space<vmem>>, vector<32x1xf32>
    %11 = vector.broadcast %10 : vector<32x1xf32> to vector<32x256xf32>
    %12 = arith.addf %9, %11 : vector<32x256xf32>
    %cst_12 = arith.constant 0.000000e+00 : f32
    %13 = vector.broadcast %cst_12 : f32 to vector<32x256xf32>
    %14 = arith.maximumf %12, %13 : vector<32x256xf32>
    %c0_13 = arith.constant 0 : index
    %c0_14 = arith.constant 0 : index
    %15 = vector.load %arg7[%c0_13, %c0_14] : memref<4x32xf32, #tpu.memory_space<vmem>>, vector<4x32xf32>
    %cst_15 = arith.constant dense<0.000000e+00> : vector<4x256xf32>
    %16 = tpu.matmul %15, %14, %cst_15 {dimension_numbers = #tpu.dot_dimension_numbers<[1], [0], [0], [1], [0, 0, 1, 1], [], []>} : vector<4x32xf32>, vector<32x256xf32>, vector<4x256xf32> -> vector<4x256xf32>
    %c0_16 = arith.constant 0 : index
    %c0_17 = arith.constant 0 : index
    %17 = vector.load %arg8[%c0_16, %c0_17] : memref<4x1xf32, #tpu.memory_space<vmem>>, vector<4x1xf32>
    %18 = vector.broadcast %17 : vector<4x1xf32> to vector<4x256xf32>
    %19 = arith.addf %16, %18 : vector<4x256xf32>
    %c0_18 = arith.constant 0 : index
    %c0_19 = arith.constant 0 : index
    %c0_20 = arith.constant 0 : index
    %20 = vector.load %arg9[%c0_18, %c0_19, %c0_20] : memref<1x4x256xf32, #tpu.memory_space<vmem>>, vector<1x4x256xf32>
    %21 = vector.shape_cast %20 : vector<1x4x256xf32> to vector<4x256xf32>
    %22 = vector.shape_cast %19 : vector<4x256xf32> to vector<1x4x256xf32>
    tpu.vector_store %arg9[%c0_18, %c0_19, %c0_20], %22 {strides = array<i32>} : memref<1x4x256xf32, #tpu.memory_space<vmem>>, vector<1x4x256xf32>,
    return
  }
  func.func @transform_0(%arg0: i32, %arg1: i32) -> (i32, i32, i32) {
    %c0_i32 = arith.constant 0 : i32
    %c0_i32_0 = arith.constant 0 : i32
    return %arg0, %c0_i32, %arg1 : i32, i32, i32
  }
  func.func @transform_1(%arg0: i32, %arg1: i32) -> (i32, i32, i32) {
    %c0_i32 = arith.constant 0 : i32
    %c0_i32_0 = arith.constant 0 : i32
    return %arg0, %c0_i32, %arg1 : i32, i32, i32
  }
  func.func @transform_2(%arg0: i32, %arg1: i32) -> (i32, i32, i32) {
    %c0_i32 = arith.constant 0 : i32
    %c0_i32_0 = arith.constant 0 : i32
    return %arg0, %c0_i32, %arg1 : i32, i32, i32
  }
  func.func @transform_3(%arg0: i32, %arg1: i32) -> (i32, i32) {
    %c0_i32 = arith.constant 0 : i32
    %c0_i32_0 = arith.constant 0 : i32
    %c0_i32_1 = arith.constant 0 : i32
    return %c0_i32, %c0_i32_0 : i32, i32
  }
  func.func @transform_4(%arg0: i32, %arg1: i32) -> (i32, i32) {
    %c0_i32 = arith.constant 0 : i32
    %c0_i32_0 = arith.constant 0 : i32
    %c0_i32_1 = arith.constant 0 : i32
    return %c0_i32, %c0_i32_0 : i32, i32
  }
  func.func @transform_5(%arg0: i32, %arg1: i32) -> (i32, i32) {
    %c0_i32 = arith.constant 0 : i32
    %c0_i32_0 = arith.constant 0 : i32
    %c0_i32_1 = arith.constant 0 : i32
    return %c0_i32, %c0_i32_0 : i32, i32
  }
  func.func @transform_6(%arg0: i32, %arg1: i32) -> (i32, i32) {
    %c0_i32 = arith.constant 0 : i32
    %c0_i32_0 = arith.constant 0 : i32
    %c0_i32_1 = arith.constant 0 : i32
    return %c0_i32, %c0_i32_0 : i32, i32
  }
  func.func @transform_7(%arg0: i32, %arg1: i32) -> (i32, i32, i32) {
    %c0_i32 = arith.constant 0 : i32
    %c0_i32_0 = arith.constant 0 : i32
    return %arg0, %c0_i32, %arg1 : i32, i32, i32
  }
}

</mosaic_0001>

<bundles_post_ra>
// kernel: tpu_custom_call.1
= control target key start
LH: loop header
LB: loop body
LE: loop exit
PB: predicated region body
PF: predicated region fallthrough
CT: control target
= control target key end

     0   :  { %12 = vsyncpa [#allocation3], 0  ;;  %s1089_s0 = inlined_call_operand.vmem [shape: f32[2,4,256], index: 0, kind: input, shape index: {}]   ;;  %s1090_s1 = inlined_call_operand.vmem [shape: f32[2,4,256], index: 1, kind: input, shape index: {}]   ;;  %s1091_s2 = inlined_call_operand.vmem [shape: f32[2,4,256], index: 2, kind: input, shape index: {}]   ;;  %s1092_s3 = inlined_call_operand.vmem [shape: f32[32,4], index: 3, kind: input, shape index: {}]   ;;  %s1093_s4 = inlined_call_operand.vmem [shape: f32[32,1], index: 4, kind: input, shape index: {}]   ;;  %s1094_s5 = inlined_call_operand.vmem [shape: f32[4,32], index: 5, kind: input, shape index: {}]   ;;  %s1095_s6 = inlined_call_operand.vmem [shape: f32[4,1], index: 6, kind: input, shape index: {}]   ;;  %s1096_s7 = inlined_call_operand.hbm [shape: f32[2,4,256], index: 7, kind: output, shape index: {}]  }
   0x1   :  { %14 = vsyncpa [#allocation3 + $0x1], 0  ;;  %s954_s24 = smov 0   ;;  %s956_s25 = smov 0  }
   0x2   :  { %s958_s26 = smov 0   ;;  %s960_s27 = smov 0  }
   0x3   :  { %s962_s28 = smov 0   ;;  %s964_s29 = smov 0  }
   0x4 LB: > { %s746_s30 = sadd.s32 4294967295, %s909_s29   ;;  %s747_s8 = sadd.s32 4294967294, %s909_s29   ;;  %s909_s29 = sphi %s964_s29, %s20_s29   ;;  %s905_s28 = sphi %s962_s28, %s1106_s28   ;;  %s901_s27 = sphi %s960_s27, %s1105_s27   ;;  %s897_s26 = sphi %s958_s26, %s1104_s26   ;;  %s893_s25 = sphi %s956_s25, %s1103_s25   ;;  %s889_s24 = sphi %s954_s24, %s1102_s24  }
   0x5   : > { %s32_s9 = sadd.s32 1, %s905_s28  ;;  %s209_s10 = sadd.s32 1, %s897_s26 }
   0x6   : > { %p34_p0 = scmp.ge.s32.totalorder %s32_s9, 2  ;;  %p219_p1 = scmp.ne.s32.totalorder %s897_s26, %s893_s25 }
   0x7   : > { %p220_p2 = scmp.eq.s32.totalorder %s746_s30, 1  ;;  %p225_p3 = scmp.ne.s32.totalorder %s893_s25, %s889_s24 }
   0x8   : > { %s1108_s9 = smov (%p34_p0, %s32_s9), 0  ;;  %p226_p5 = scmp.eq.s32.totalorder %s747_s8, 1 }
   0x9   : > { %1098 = sst [smem:[#allocation5_spill]] %s1108_s9  ;;  %p994_p4 = por %p220_p2, %p219_p1 }
   0xa   : > { %s204_s12 = ssub.s32 %s905_s28, %s1108_s9  ;;  %p750_p6 = scmp.ge.s32.totalorder %s909_s29, 1 }
   0xb   : > { %p207_p7 = scmp.eq.s32.totalorder %s204_s12, 0  ;;  %p1001_p8 = por %p226_p5, %p225_p3 }
   0xc   : > { %p295_p9 = scmp.lt.s32.totalorder %s909_s29, 3 }
   0xd   : > { %s1007_s14 = scalar_select %p207_p7, %s897_s26, %s209_s10  }
   0xe   : > { %p296_p10 = pnand %p750_p6, %p295_p9 }
   0xf   : > { %p350_p11 = scmp.lt.s32.totalorder (!%p296_p10), %s901_s27, 1  ;;  %s346_s19 = sand.u32 (!%p296_p10), 1, %s893_s25  }
  0x10   : > { %299 = sbr.rel (%p296_p10) target bundleno = 466 (0x1d2), region = 48  ;;  %s773_s21 = sshll.u32 (!%p296_p10), %s901_s27, 7 }
  0x11   : > { %s618_s8 = scalar_lea.sflag (!%p296_p10), [#allocation3], %s346_s19 }
  0x15   : > { %v911_v0 = vmov 0.0   ;;  %v390_v1 = vld [vmem:[%s1093_s4 + $0x8] sm:$0xff]  ;;  %s351_s17 = scalar_select %p350_p11, %s901_s27, 1  ;;  %v912_v2 = vmov 0   ;;  %v392_v3 = vld [vmem:[%s1093_s4 + $0x18] sm:$0xff]  ;;  %v389_v4 = vld [vmem:[%s1093_s4] sm:$0xff] }
  0x16   : > { %497 = vmatprep.mubr.f32.mxu0 %v911_v0  ;;  %605 = vmatprep.mubr.f32.mxu1 %v911_v0  ;;  %v391_v5 = vld [vmem:[%s1093_s4 + $0x10] sm:$0xff]  ;;  %v531_v10 = vld [vmem:[%s1095_s6] sm:$0xf]  ;;  %vm428_vm0 = vcmask 1043456   ;;  %vm415_vm1 = vcmask 31744   ;;  %v386_v14 = vld [vmem:[%s1092_s3 + $0x8] sm:$0xff] }
  0x17   : > { %832 = vset.pattern.permute.xlu1 %v912_v2  ;;  %831 = vset.pattern.permute.xlu0 %v912_v2  ;;  %s770_s20 = sshll.u32 %s351_s17, 3  ;;  %v385_v13 = vld [vmem:[%s1092_s3] sm:$0xff]  ;;  %v387_v15 = vld [vmem:[%s1092_s3 + $0x10] sm:$0xff]  ;;  %v388_v16 = vld [vmem:[%s1092_s3 + $0x18] sm:$0xff]  ;;  %vm537_vm2 = vcmask 261120  }
  0x18   : > { %400 = vperm.xlu1 %832, %v390_v1   ;;  %410 = vperm.xlu0 %831, %v392_v3   ;;  %s357_s12 = scalar_lea.vmem %s1089_s0, %s770_s20  ;;  %s367_s18 = scalar_lea.vmem %s1090_s1, %s770_s20  ;;  %v530_v45 = vld [vmem:[%s1094_s5] sm:$0xf] }
  0x19   : > { %s377_s17 = scalar_lea.vmem %s1091_s2, %s770_s20  ;;  %v380_v6 = vld [vmem:[%s357_s12] sm:$0xff]  ;;  %s632_s20 = scalar_lea.hbm %s1096_s7, %s773_s21 }
  0x1a   : > { %v381_v7 = vld [vmem:[%s367_s18] sm:$0xff]  ;;  %s913_s12 = smov [#allocation2]  }
  0x1b   : > { %v382_v8 = vadd.f32 %v381_v7, %v380_v6  ;;  %v383_v9 = vld [vmem:[%s377_s17] sm:$0xff]  ;;  %s751_s17 = sshll.u32 %s346_s19, 3  ;;  %s837_s15 = sshll.u32 %s913_s12, 4  ;;  %s838_s15 = int_to_ptr.vmem [resolvable:$false] %s837_s15 }
  0x1c   : > { %395 = vperm.xlu1 %832, %v389_v4   ;;  %405 = vperm.xlu0 %831, %v391_v5   ;;  %s348_s22 = scalar_lea.vmem [#allocation2], %s751_s17  ;;  %s839_s27 = scalar_lea.vmem %s838_s15, 256 }
  0x1d   : > { %v384_v11 = vadd.f32 %v383_v9, %v382_v8  ;;  %s634_s23 = sshll.u32 %s348_s22, 4  ;;  %s635_s23 = int_to_ptr.vmem [resolvable:$true] %s634_s23 }
  0x1e   : > { %s833_s10 = scalar_lea.vmem %s635_s23, 128  ;;  %p840_p1 = scmp.lt.s32.totalorder %s635_s23, %s838_s15 }
  0x1f   : > { %v414_v12 = vcombine.high %v384_v11, %v384_v11  ;;  %p834_p12 = scmp.ne.s32.totalorder %s635_s23, %s833_s10  ;;  %p841_p2 = scmp.lt.s32.totalorder %s839_s27, %s833_s10 }
  0x20   : > { %534 = vperm.xlu0 %831, %v531_v10  }
  0x21   : > { %758 = vmatprep.subr.msk.mxu0 %vm428_vm0, %v414_v12  ;;  %p835_p13 = pnand %p834_p12, %p994_p4  ;;  %p842_p3 = por %p841_p2, %p840_p1 }
  0x22   : > { %759 = vmatpush1.msk.msra.mxu0 %vm428_vm0, %v384_v11 }
  0x23   : > { %760 = vmatmul.mubr.msk.f32.vlgmr.msra.gmra.mxu0 %vm415_vm1, %v385_v13  ;;  %p836_p0 = pneg %p835_p13 }
  0x24   : > { %503 = vmatprep.mubr.f32.mxu0 %v911_v0 }
  0x25   : > { %p843_p5 = pnand %p842_p3, %p836_p0 }
  0x27   : > { %761 = vmatmul.mubr.msk.f32.gmra.mxu0 %vm415_vm1, %v386_v14 }
  0x28   : > { %509 = vmatprep.mubr.f32.mxu0 %v911_v0 }
  0x2b   : > { %762 = vmatmul.mubr.msk.f32.gmra.mxu0 %vm415_vm1, %v387_v15 }
  0x2c   : > { %515 = vmatprep.mubr.f32.mxu0 %v911_v0 }
  0x2f   : > { %763 = vmatmul.mubr.msk.f32.gmra.mxu0 %vm415_vm1, %v388_v16 }
  0x93   : > { %v411_v21 = vpop.permute.xlu0 %410  ;;  %v401_v24 = vpop.permute.xlu1 %400 }
  0x97   : > { %v406_v26 = vpop.permute.xlu0 %405  ;;  %v396_v32 = vpop.permute.xlu1 %395 }
  0x9b   : > { %v535_v47 = vpop.permute.xlu0 %534 }
  0xe3   : > { %v499_v17 = vpop.f32.mrf.mxu0 }
  0xe4   : > { %v500_v39 = vadd.f32 %v499_v17, %v396_v32 }
  0xe5   : > { %v501_v18 = vpop.f32.mrf.mxu0 }
  0xe6   : > { %v502_v37 = vadd.f32 %v501_v18, %v396_v32  ;;  %v522_v44 = vmax.f32 %v500_v39, 0.0 }
  0xe7   : > { %v505_v19 = vpop.f32.mrf.mxu0 }
  0xe8   : > { %v506_v35 = vadd.f32 %v505_v19, %v401_v24  ;;  %v523_v43 = vmax.f32 %v502_v37, 0.0 }
  0xe9   : > { %v507_v20 = vpop.f32.mrf.mxu0 }
  0xea   : > { %v508_v33 = vadd.f32 %v507_v20, %v401_v24  ;;  %v524_v42 = vmax.f32 %v506_v35, 0.0 }
  0xeb   : > { %v511_v22 = vpop.f32.mrf.mxu0 }
  0xec   : > { %v512_v31 = vadd.f32 %v511_v22, %v406_v26  ;;  %v525_v41 = vmax.f32 %v508_v33, 0.0 }
  0xed   : > { %v513_v23 = vpop.f32.mrf.mxu0 }
  0xee   : > { %v514_v29 = vadd.f32 %v513_v23, %v406_v26  ;;  %v526_v40 = vmax.f32 %v512_v31, 0.0 }
  0xef   : > { %v517_v25 = vpop.f32.mrf.mxu0 }
  0xf0   : > { %v518_v27 = vadd.f32 %v517_v25, %v411_v21  ;;  %v527_v38 = vmax.f32 %v514_v29, 0.0 }
  0xf1   : > { %v519_v28 = vpop.f32.mrf.mxu0 }
  0xf2   : > { %v520_v30 = vadd.f32 %v519_v28, %v411_v21  ;;  %v528_v36 = vmax.f32 %v518_v27, 0.0 }
  0xf4   : > { %v529_v34 = vmax.f32 %v520_v30, 0.0 }
  0xf6   : > { %565 = vmatprep.subr.mxu1 %v529_v34 }
  0xf7   : > { %566 = vmatpush1.msra.mxu1 %v528_v36 }
  0xf8   : > { %567 = vmatprep.subr.mxu1 %v527_v38 }
  0xf9   : > { %568 = vmatpush1.msra.mxu1 %v526_v40 }
  0xfa   : > { %569 = vmatprep.subr.mxu1 %v525_v41 }
  0xfb   : > { %570 = vmatpush1.msra.mxu1 %v524_v42 }
  0xfc   : > { %571 = vmatprep.subr.mxu1 %v523_v43 }
  0xfd   : > { %572 = vmatpush1.msra.mxu1 %v522_v44 }
  0xfe   : > { %764 = vmatmul.mubr.msk.f32.vlgmr.msra.gmra.mxu1 %vm537_vm2, %v530_v45 }
 0x1be   : > { %v607_v46 = vpop.f32.mrf.mxu1 }
 0x1bf   : > { %v608_v49 = vadd.f32 %v607_v46, %v535_v47 }
 0x1c0   : > { %v609_v48 = vpop.f32.mrf.mxu1 }
 0x1c1   : > { %v610_v50 = vadd.f32 %v609_v48, %v535_v47 }
 0x1c3   : > { %v614_v51 = vcombine.low %v608_v49, %v610_v50 }
 0x1c5   : > { %616 = vst [vmem:[%s348_s22] sm:$0xff] %v614_v51 }
 0x1c6   : > { %846 = shalt.err (!%p843_p5)
}
 0x1c7   : > { %s847_s16 = scalar_lea.hbm %s632_s20, 128  ;;  %s851_s17 = scalar_lea.hbm %s1096_s7, 256 }
 0x1c8   : > { %p848_p6 = scmp.ne.s32.totalorder %s632_s20, %s847_s16  ;;  %p852_p10 = scmp.lt.s32.totalorder %s632_s20, %s1096_s7 }
 0x1c9   : > { %p853_p11 = scmp.lt.s32.totalorder %s851_s17, %s847_s16 }
 0x1ca   : > { %p849_p7 = pnand %p848_p6, %p994_p4 }
 0x1cb   : > { %p854_p12 = por %p853_p11, %p852_p10 }
 0x1cc   : > { %p850_p9 = pneg %p849_p7 }
 0x1ce   : > { %p855_p13 = pnand %p854_p12, %p850_p9 }
 0x1d0   : > { %858 = shalt.err (!%p855_p13)
}
 0x1d1   : > { %774 = dma.vmem_to_hbm [thread:$0]  (%p994_p4), %s635_s23, 128, %s632_s20, %s618_s8  }
 0x1d2 PF: > { %p780_p0 = scmp.ge.s32.totalorder %s909_s29, 2  ;;  %s646_s30 = sand.u32 1, %s889_s24  }
 0x1d3   : > { %s647_s9 = scalar_lea.sflag [#allocation3], %s646_s30 }
 0x1d4   : > { %p777_p1 = pnand %p780_p0, %p1001_p8 }
 0x1d6   : > { %p778_p2 = pneg %p777_p1 }
 0x1d8   : > { %884 = dma.done.wait (%p778_p2), %s647_s9, 128  }
 0x1d9   : > { %886 = vsyncadd (%p778_p2), %s647_s9, 4294967168  ;;  %s20_s29 = sadd.s32 1, %s909_s29   ;;  %s1101_s11 = sld [smem:[#allocation5_spill]] }
 0x1da   : > { %p17_p3 = scmp.ge.s32.totalorder %s20_s29, 4   ;;  %s1102_s24 = smov %s893_s25 }
 0x1db   : > { %s1103_s25 = smov %s897_s26  ;;  %s1104_s26 = smov %s1007_s14 }
 0x1dc   : > { %s1105_s27 = smov %s905_s28  ;;  %19 = sbr.rel (!%p17_p3) target bundleno = 4 (0x4), region = 89 }
 0x1df   : > { %s1106_s28 = smov %s1101_s11 }
 0x1e1   :  { %652 = vsyncpa [#allocation3], 1 }
 0x1e2   :  { %654 = vsyncpa [#allocation3 + $0x1], 1 }

</bundles_post_ra>
